<compile_context>
chip_gen: v7x
topology: tpu7x:2x2x1
jax: 0.10.0
libtpu: 0.0.40
codegen_flags: <defaults>
</compile_context>

<pallas_src>
import math
import jax
import jax.numpy as jnp
from jax.experimental import pallas as pl
from jax.experimental.pallas import tpu as pltpu

# ----------------------------- model config ---------------------------------
DIM = 64            # query_dim
CTX_DIM = 32        # context_dim
D_HEAD = 32         # dim_head
N_HEADS = 2         # heads
INNER = N_HEADS * D_HEAD   # = 64


# ------------------------------ Pallas kernel --------------------------------
def cross_attention_kernel(x_ref, ctx_ref, wq_ref, wk_ref, wv_ref, wo_ref,
                           bo_ref, o_ref):
    # x_ref   : (1, N, DIM)        query tokens (f32)
    # ctx_ref : (1, M, CTX_DIM)    context tokens (f32)
    # wq_ref  : (DIM, INNER)       bf16, heads fused along the output dim
    # wk_ref  : (CTX_DIM, INNER)   bf16
    # wv_ref  : (CTX_DIM, INNER)   bf16
    # wo_ref  : (INNER, DIM)       bf16 (to_out weight)
    # bo_ref  : (1, DIM)           f32  (to_out bias)
    # o_ref   : (1, N, DIM)        f32 output tokens
    x = x_ref[0].astype(jnp.bfloat16)        # (N, DIM)
    ctx = ctx_ref[0].astype(jnp.bfloat16)    # (M, CTX_DIM)

    # Head-fused QKV projections — single fat MXU matmuls, f32 accumulation.
    q = jnp.dot(x, wq_ref[...], preferred_element_type=jnp.float32)     # (N, INNER)
    k = jnp.dot(ctx, wk_ref[...], preferred_element_type=jnp.float32)   # (M, INNER)
    v = jnp.dot(ctx, wv_ref[...], preferred_element_type=jnp.float32)   # (M, INNER)

    scale = 1.0 / math.sqrt(D_HEAD)
    head_outs = []
    for h in range(N_HEADS):                 # tiny static head loop
        sl = slice(h * D_HEAD, (h + 1) * D_HEAD)
        qh = q[:, sl].astype(jnp.bfloat16)   # (N, dh)
        kh = k[:, sl].astype(jnp.bfloat16)   # (M, dh)
        vh = v[:, sl].astype(jnp.bfloat16)   # (M, dh)

        # scores: contract the head dim directly (no explicit transpose).
        s = jax.lax.dot_general(qh, kh, (((1,), (1,)), ((), ())),
                                preferred_element_type=jnp.float32) * scale  # (N, M)
        s = s - jnp.max(s, axis=-1, keepdims=True)
        p = jnp.exp(s)                                    # un-normalized probs (f32)
        l = jnp.sum(p, axis=-1, keepdims=True)            # (N, 1)

        oh = jnp.dot(p.astype(jnp.bfloat16), vh,
                     preferred_element_type=jnp.float32)  # (N, dh)
        # Deferred softmax normalization: scale the small (N, dh) output on the EUP
        # instead of dividing the (N, M) probability tile on the VPU.
        head_outs.append(oh * pl.reciprocal(l, approx=True))

    attn = jnp.concatenate(head_outs, axis=-1)            # (N, INNER) f32

    # Head-fused output projection + bias (to_out; Dropout is identity in eval).
    out = jnp.dot(attn.astype(jnp.bfloat16), wo_ref[...],
                  preferred_element_type=jnp.float32) + bo_ref[...]
    o_ref[0] = out


def run_cross_attention_pallas(x_tok, ctx_tok, wq, wk, wv, wo, bo):
    """x_tok: (B, N, DIM) f32; ctx_tok: (B, M, CTX_DIM) f32; weights bf16, bias f32."""
    B, N, D = x_tok.shape
    M = ctx_tok.shape[1]
    const2 = lambda b: (0, 0)   # weights: constant blocks -> DMA'd once

    return pl.pallas_call(
        cross_attention_kernel,
        out_shape=jax.ShapeDtypeStruct((B, N, D), jnp.float32),
        grid=(B,),
        in_specs=[
            pl.BlockSpec((1, N, D), lambda b: (b, 0, 0)),
            pl.BlockSpec((1, M, CTX_DIM), lambda b: (b, 0, 0)),
            pl.BlockSpec((D, INNER), const2),
            pl.BlockSpec((CTX_DIM, INNER), const2),
            pl.BlockSpec((CTX_DIM, INNER), const2),
            pl.BlockSpec((INNER, D), const2),
            pl.BlockSpec((1, D), const2),
        ],
        out_specs=pl.BlockSpec((1, N, D), lambda b: (b, 0, 0)),
        compiler_params=pltpu.CompilerParams(
            dimension_semantics=("parallel",)),   # 2-wide -> both v7x TensorCores
    )(x_tok, ctx_tok, wq, wk, wv, wo, bo)


# ------------------------------- glue / setup --------------------------------
def make_params(key):
    ks = jax.random.split(key, 5)
    sc = 0.05
    # Stored pre-transposed (in_dim, out_dim) so y = x @ W; heads fused in out dim.
    wq = sc * jax.random.normal(ks[0], (DIM, INNER), jnp.float32)
    wk = sc * jax.random.normal(ks[1], (CTX_DIM, INNER), jnp.float32)
    wv = sc * jax.random.normal(ks[2], (CTX_DIM, INNER), jnp.float32)
    wo = sc * jax.random.normal(ks[3], (INNER, DIM), jnp.float32)
    bo = sc * jax.random.normal(ks[4], (1, DIM), jnp.float32)
    return dict(wq=wq, wk=wk, wv=wv, wo=wo, bo=bo)


def cross_attention_forward(x_ncthw, context_nchw, params):
    """CrossAttention.forward (eval, non-window path).
    x: [B, DIM, T, H, W], context: [B, CTX_DIM, H1, W1] -> [B, T*H*W, DIM] tokens."""
    B, D, T, H, W = x_ncthw.shape
    _, Dc, H1, W1 = context_nchw.shape
    # TODO(synk): window-attention branch (window_partition / window_reverse) is
    # only taken when H1*W1 > 64*64; not implemented for these shapes.
    N = T * H * W
    M = H1 * W1

    # b d t h w -> b (t h w) d   /   b d h w -> b (h w) d  (pure layout glue)
    x_tok = jnp.transpose(x_ncthw, (0, 2, 3, 4, 1)).reshape(B, N, D)
    ctx_tok = jnp.transpose(context_nchw, (0, 2, 3, 1)).reshape(B, M, Dc)

    bf = jnp.bfloat16
    return run_cross_attention_pallas(
        x_tok, ctx_tok,
        params["wq"].astype(bf), params["wk"].astype(bf),
        params["wv"].astype(bf), params["wo"].astype(bf),
        params["bo"])


# ------------------------------ JAX reference ---------------------------------
def reference_cross_attention(x_ncthw, context_nchw, params):
    B, D, T, H, W = x_ncthw.shape
    _, Dc, H1, W1 = context_nchw.shape
    N, M = T * H * W, H1 * W1
    x = jnp.transpose(x_ncthw, (0, 2, 3, 4, 1)).reshape(B, N, D)
    ctx = jnp.transpose(context_nchw, (0, 2, 3, 1)).reshape(B, M, Dc)

    hi = jax.lax.Precision.HIGHEST
    q = jnp.einsum("bnd,de->bne", x, params["wq"], precision=hi)
    k = jnp.einsum("bmd,de->bme", ctx, params["wk"], precision=hi)
    v = jnp.einsum("bmd,de->bme", ctx, params["wv"], precision=hi)
    q = q.reshape(B, N, N_HEADS, D_HEAD)
    k = k.reshape(B, M, N_HEADS, D_HEAD)
    v = v.reshape(B, M, N_HEADS, D_HEAD)
    s = jnp.einsum("bnhd,bmhd->bhnm", q, k, precision=hi) / math.sqrt(D_HEAD)
    p = jax.nn.softmax(s, axis=-1)
    o = jnp.einsum("bhnm,bmhd->bnhd", p, v, precision=hi).reshape(B, N, INNER)
    return jnp.einsum("bne,ed->bnd", o, params["wo"], precision=hi) + params["bo"][0]


# ---------------------------------- main --------------------------------------
if __name__ == "__main__":
    key = jax.random.PRNGKey(0)
    kx, kc, kp = jax.random.split(key, 3)

    B, T, H, W = 2, 2, 4, 4
    H1, W1 = 4, 4
    x = jax.random.normal(kx, (B, DIM, T, H, W), jnp.float32)           # NCTHW
    context = jax.random.normal(kc, (B, CTX_DIM, H1, W1), jnp.float32)  # NCHW
    params = make_params(kp)

    out = jax.jit(cross_attention_forward)(x, context, params)
    out = jax.block_until_ready(out)

    ref = reference_cross_attention(x, context, params)
    assert out.shape == (B, T * H * W, DIM)
    assert bool(jnp.all(jnp.isfinite(out)))
    max_err = float(jnp.max(jnp.abs(out - ref)))
    assert max_err < 5e-2, f"mismatch vs reference: {max_err}"

    print("KERNEL_OK")
</pallas_src>

<mosaic_0001>
module attributes {stable_mosaic.version = 11 : i64} {
  func.func @cross_attention_kernel(%arg0: i32, %arg1: memref<1x32x64xf32, #tpu.memory_space<vmem>>, %arg2: memref<1x16x32xf32, #tpu.memory_space<vmem>>, %arg3: memref<64x64xbf16, #tpu.memory_space<vmem>>, %arg4: memref<32x64xbf16, #tpu.memory_space<vmem>>, %arg5: memref<32x64xbf16, #tpu.memory_space<vmem>>, %arg6: memref<64x64xbf16, #tpu.memory_space<vmem>>, %arg7: memref<1x64xf32, #tpu.memory_space<vmem>>, %arg8: memref<1x32x64xf32, #tpu.memory_space<vmem>>) attributes {dimension_semantics = [#tpu.dimension_semantics<parallel>], iteration_bounds = array<i64: 2>, scalar_prefetch = 0 : i64, scratch_operands = 0 : i64, tpu.core_type = #tpu.core_type<tc>, window_params = [{transform_indices = @transform_0, window_bounds = array<i64: 1, 32, 64>}, {transform_indices = @transform_1, window_bounds = array<i64: 1, 16, 32>}, {pipeline_mode = #tpu.pipeline_mode<synchronous>, transform_indices = @transform_2, window_bounds = array<i64: 64, 64>}, {pipeline_mode = #tpu.pipeline_mode<synchronous>, transform_indices = @transform_3, window_bounds = array<i64: 32, 64>}, {pipeline_mode = #tpu.pipeline_mode<synchronous>, transform_indices = @transform_4, window_bounds = array<i64: 32, 64>}, {pipeline_mode = #tpu.pipeline_mode<synchronous>, transform_indices = @transform_5, window_bounds = array<i64: 64, 64>}, {pipeline_mode = #tpu.pipeline_mode<synchronous>, transform_indices = @transform_6, window_bounds = array<i64: 1, 64>}, {transform_indices = @transform_7, window_bounds = array<i64: 1, 32, 64>}]} {
    %c0 = arith.constant 0 : index
    %c0_0 = arith.constant 0 : index
    %c0_1 = arith.constant 0 : index
    %0 = vector.load %arg1[%c0, %c0_0, %c0_1] : memref<1x32x64xf32, #tpu.memory_space<vmem>>, vector<1x32x64xf32>
    %1 = vector.shape_cast %0 : vector<1x32x64xf32> to vector<32x64xf32>
    %2 = arith.truncf %1 : vector<32x64xf32> to vector<32x64xbf16>
    %c0_2 = arith.constant 0 : index
    %c0_3 = arith.constant 0 : index
    %c0_4 = arith.constant 0 : index
    %3 = vector.load %arg2[%c0_2, %c0_3, %c0_4] : memref<1x16x32xf32, #tpu.memory_space<vmem>>, vector<1x16x32xf32>
    %4 = vector.shape_cast %3 : vector<1x16x32xf32> to vector<16x32xf32>
    %5 = arith.truncf %4 : vector<16x32xf32> to vector<16x32xbf16>
    %c0_5 = arith.constant 0 : index
    %c0_6 = arith.constant 0 : index
    %6 = vector.load %arg3[%c0_5, %c0_6] : memref<64x64xbf16, #tpu.memory_space<vmem>>, vector<64x64xbf16>
    %cst = arith.constant dense<0.000000e+00> : vector<32x64xf32>
    %7 = tpu.matmul %2, %6, %cst {dimension_numbers = #tpu.dot_dimension_numbers<[1], [0], [0], [1], [0, 0, 1, 1], [], []>} : vector<32x64xbf16>, vector<64x64xbf16>, vector<32x64xf32> -> vector<32x64xf32>
    %c0_7 = arith.constant 0 : index
    %c0_8 = arith.constant 0 : index
    %8 = vector.load %arg4[%c0_7, %c0_8] : memref<32x64xbf16, #tpu.memory_space<vmem>>, vector<32x64xbf16>
    %cst_9 = arith.constant dense<0.000000e+00> : vector<16x64xf32>
    %9 = tpu.matmul %5, %8, %cst_9 {dimension_numbers = #tpu.dot_dimension_numbers<[1], [0], [0], [1], [0, 0, 1, 1], [], []>} : vector<16x32xbf16>, vector<32x64xbf16>, vector<16x64xf32> -> vector<16x64xf32>
    %c0_10 = arith.constant 0 : index
    %c0_11 = arith.constant 0 : index
    %10 = vector.load %arg5[%c0_10, %c0_11] : memref<32x64xbf16, #tpu.memory_space<vmem>>, vector<32x64xbf16>
    %cst_12 = arith.constant dense<0.000000e+00> : vector<16x64xf32>
    %11 = tpu.matmul %5, %10, %cst_12 {dimension_numbers = #tpu.dot_dimension_numbers<[1], [0], [0], [1], [0, 0, 1, 1], [], []>} : vector<16x32xbf16>, vector<32x64xbf16>, vector<16x64xf32> -> vector<16x64xf32>
    %12 = vector.extract_strided_slice %7 {offsets = [0, 0], sizes = [32, 32], strides = [1, 1]} : vector<32x64xf32> to vector<32x32xf32>
    %13 = arith.truncf %12 : vector<32x32xf32> to vector<32x32xbf16>
    %14 = vector.extract_strided_slice %9 {offsets = [0, 0], sizes = [16, 32], strides = [1, 1]} : vector<16x64xf32> to vector<16x32xf32>
    %15 = arith.truncf %14 : vector<16x32xf32> to vector<16x32xbf16>
    %16 = vector.extract_strided_slice %11 {offsets = [0, 0], sizes = [16, 32], strides = [1, 1]} : vector<16x64xf32> to vector<16x32xf32>
    %17 = arith.truncf %16 : vector<16x32xf32> to vector<16x32xbf16>
    %cst_13 = arith.constant dense<0.000000e+00> : vector<32x16xf32>
    %18 = tpu.matmul %13, %15, %cst_13 {dimension_numbers = #tpu.dot_dimension_numbers<[1], [1], [0], [0], [0, 0, 1, 0], [], []>} : vector<32x32xbf16>, vector<16x32xbf16>, vector<32x16xf32> -> vector<32x16xf32>
    %cst_14 = arith.constant 0.176776692 : f32
    %19 = vector.broadcast %cst_14 : f32 to vector<32x16xf32>
    %20 = arith.mulf %18, %19 : vector<32x16xf32>
    %cst_15 = arith.constant dense<0xFF800000> : vector<32xf32>
    %21 = vector.multi_reduction <maximumf>, %20, %cst_15 [1] : vector<32x16xf32> to vector<32xf32>
    %22 = vector.shape_cast %21 : vector<32xf32> to vector<32x1xf32>
    %23 = vector.broadcast %22 : vector<32x1xf32> to vector<32x16xf32>
    %24 = arith.subf %20, %23 : vector<32x16xf32>
    %25 = math.exp %24 : vector<32x16xf32>
    %cst_16 = arith.constant dense<0.000000e+00> : vector<32xf32>
    %26 = vector.multi_reduction <add>, %25, %cst_16 [1] : vector<32x16xf32> to vector<32xf32>
    %27 = vector.shape_cast %26 : vector<32xf32> to vector<32x1xf32>
    %28 = arith.truncf %25 : vector<32x16xf32> to vector<32x16xbf16>
    %cst_17 = arith.constant dense<0.000000e+00> : vector<32x32xf32>
    %29 = tpu.matmul %28, %17, %cst_17 {dimension_numbers = #tpu.dot_dimension_numbers<[1], [0], [0], [1], [0, 0, 1, 1], [], []>} : vector<32x16xbf16>, vector<16x32xbf16>, vector<32x32xf32> -> vector<32x32xf32>
    %30 = tpu.reciprocal %27 {approx = true} : vector<32x1xf32> -> vector<32x1xf32>
    %31 = vector.broadcast %30 : vector<32x1xf32> to vector<32x32xf32>
    %32 = arith.mulf %29, %31 : vector<32x32xf32>
    %33 = vector.extract_strided_slice %7 {offsets = [0, 32], sizes = [32, 32], strides = [1, 1]} : vector<32x64xf32> to vector<32x32xf32>
    %34 = arith.truncf %33 : vector<32x32xf32> to vector<32x32xbf16>
    %35 = vector.extract_strided_slice %9 {offsets = [0, 32], sizes = [16, 32], strides = [1, 1]} : vector<16x64xf32> to vector<16x32xf32>
    %36 = arith.truncf %35 : vector<16x32xf32> to vector<16x32xbf16>
    %37 = vector.extract_strided_slice %11 {offsets = [0, 32], sizes = [16, 32], strides = [1, 1]} : vector<16x64xf32> to vector<16x32xf32>
    %38 = arith.truncf %37 : vector<16x32xf32> to vector<16x32xbf16>
    %cst_18 = arith.constant dense<0.000000e+00> : vector<32x16xf32>
    %39 = tpu.matmul %34, %36, %cst_18 {dimension_numbers = #tpu.dot_dimension_numbers<[1], [1], [0], [0], [0, 0, 1, 0], [], []>} : vector<32x32xbf16>, vector<16x32xbf16>, vector<32x16xf32> -> vector<32x16xf32>
    %cst_19 = arith.constant 0.176776692 : f32
    %40 = vector.broadcast %cst_19 : f32 to vector<32x16xf32>
    %41 = arith.mulf %39, %40 : vector<32x16xf32>
    %cst_20 = arith.constant dense<0xFF800000> : vector<32xf32>
    %42 = vector.multi_reduction <maximumf>, %41, %cst_20 [1] : vector<32x16xf32> to vector<32xf32>
    %43 = vector.shape_cast %42 : vector<32xf32> to vector<32x1xf32>
    %44 = vector.broadcast %43 : vector<32x1xf32> to vector<32x16xf32>
    %45 = arith.subf %41, %44 : vector<32x16xf32>
    %46 = math.exp %45 : vector<32x16xf32>
    %cst_21 = arith.constant dense<0.000000e+00> : vector<32xf32>
    %47 = vector.multi_reduction <add>, %46, %cst_21 [1] : vector<32x16xf32> to vector<32xf32>
    %48 = vector.shape_cast %47 : vector<32xf32> to vector<32x1xf32>
    %49 = arith.truncf %46 : vector<32x16xf32> to vector<32x16xbf16>
    %cst_22 = arith.constant dense<0.000000e+00> : vector<32x32xf32>
    %50 = tpu.matmul %49, %38, %cst_22 {dimension_numbers = #tpu.dot_dimension_numbers<[1], [0], [0], [1], [0, 0, 1, 1], [], []>} : vector<32x16xbf16>, vector<16x32xbf16>, vector<32x32xf32> -> vector<32x32xf32>
    %51 = tpu.reciprocal %48 {approx = true} : vector<32x1xf32> -> vector<32x1xf32>
    %52 = vector.broadcast %51 : vector<32x1xf32> to vector<32x32xf32>
    %53 = arith.mulf %50, %52 : vector<32x32xf32>
    %54 = tpu.concatenate %32, %53 in 1 : vector<32x32xf32>, vector<32x32xf32> -> vector<32x64xf32>
    %55 = arith.truncf %54 : vector<32x64xf32> to vector<32x64xbf16>
    %c0_23 = arith.constant 0 : index
    %c0_24 = arith.constant 0 : index
    %56 = vector.load %arg6[%c0_23, %c0_24] : memref<64x64xbf16, #tpu.memory_space<vmem>>, vector<64x64xbf16>
    %cst_25 = arith.constant dense<0.000000e+00> : vector<32x64xf32>
    %57 = tpu.matmul %55, %56, %cst_25 {dimension_numbers = #tpu.dot_dimension_numbers<[1], [0], [0], [1], [0, 0, 1, 1], [], []>} : vector<32x64xbf16>, vector<64x64xbf16>, vector<32x64xf32> -> vector<32x64xf32>
    %c0_26 = arith.constant 0 : index
    %c0_27 = arith.constant 0 : index
    %58 = vector.load %arg7[%c0_26, %c0_27] : memref<1x64xf32, #tpu.memory_space<vmem>>, vector<1x64xf32>
    %59 = vector.broadcast %58 : vector<1x64xf32> to vector<32x64xf32>
    %60 = arith.addf %57, %59 : vector<32x64xf32>
    %c0_28 = arith.constant 0 : index
    %c0_29 = arith.constant 0 : index
    %c0_30 = arith.constant 0 : index
    %61 = vector.load %arg8[%c0_28, %c0_29, %c0_30] : memref<1x32x64xf32, #tpu.memory_space<vmem>>, vector<1x32x64xf32>
    %62 = vector.shape_cast %61 : vector<1x32x64xf32> to vector<32x64xf32>
    %63 = vector.shape_cast %60 : vector<32x64xf32> to vector<1x32x64xf32>
    tpu.vector_store %arg8[%c0_28, %c0_29, %c0_30], %63 {strides = array<i32>} : memref<1x32x64xf32, #tpu.memory_space<vmem>>, vector<1x32x64xf32>,
    return
  }
  func.func @transform_0(%arg0: i32) -> (i32, i32, i32) {
    %c0_i32 = arith.constant 0 : i32
    %c0_i32_0 = arith.constant 0 : i32
    %c0_i32_1 = arith.constant 0 : i32
    return %arg0, %c0_i32, %c0_i32_0 : i32, i32, i32
  }
  func.func @transform_1(%arg0: i32) -> (i32, i32, i32) {
    %c0_i32 = arith.constant 0 : i32
    %c0_i32_0 = arith.constant 0 : i32
    %c0_i32_1 = arith.constant 0 : i32
    return %arg0, %c0_i32, %c0_i32_0 : i32, i32, i32
  }
  func.func @transform_2(%arg0: i32) -> (i32, i32) {
    %c0_i32 = arith.constant 0 : i32
    %c0_i32_0 = arith.constant 0 : i32
    %c0_i32_1 = arith.constant 0 : i32
    return %c0_i32, %c0_i32_0 : i32, i32
  }
  func.func @transform_3(%arg0: i32) -> (i32, i32) {
    %c0_i32 = arith.constant 0 : i32
    %c0_i32_0 = arith.constant 0 : i32
    %c0_i32_1 = arith.constant 0 : i32
    return %c0_i32, %c0_i32_0 : i32, i32
  }
  func.func @transform_4(%arg0: i32) -> (i32, i32) {
    %c0_i32 = arith.constant 0 : i32
    %c0_i32_0 = arith.constant 0 : i32
    %c0_i32_1 = arith.constant 0 : i32
    return %c0_i32, %c0_i32_0 : i32, i32
  }
  func.func @transform_5(%arg0: i32) -> (i32, i32) {
    %c0_i32 = arith.constant 0 : i32
    %c0_i32_0 = arith.constant 0 : i32
    %c0_i32_1 = arith.constant 0 : i32
    return %c0_i32, %c0_i32_0 : i32, i32
  }
  func.func @transform_6(%arg0: i32) -> (i32, i32) {
    %c0_i32 = arith.constant 0 : i32
    %c0_i32_0 = arith.constant 0 : i32
    %c0_i32_1 = arith.constant 0 : i32
    return %c0_i32, %c0_i32_0 : i32, i32
  }
  func.func @transform_7(%arg0: i32) -> (i32, i32, i32) {
    %c0_i32 = arith.constant 0 : i32
    %c0_i32_0 = arith.constant 0 : i32
    %c0_i32_1 = arith.constant 0 : i32
    return %arg0, %c0_i32, %c0_i32_0 : i32, i32, i32
  }
}

</mosaic_0001>

<bundles_post_ra>
// kernel: cross_attention_forward.1
= control target key start
LH: loop header
LB: loop body
LE: loop exit
PB: predicated region body
PF: predicated region fallthrough
CT: control target
= control target key end

     0   :  { %12 = vsyncpa [#allocation3], 0  ;;  %s1608_s0 = inlined_call_operand.vmem [shape: f32[2,32,64], index: 0, kind: input, shape index: {}]   ;;  %s1609_s1 = inlined_call_operand.vmem [shape: f32[2,16,32], index: 1, kind: input, shape index: {}]   ;;  %s1610_s2 = inlined_call_operand.vmem [shape: bf16[64,64], index: 2, kind: input, shape index: {}]   ;;  %s1611_s3 = inlined_call_operand.vmem [shape: bf16[32,64], index: 3, kind: input, shape index: {}]   ;;  %s1612_s4 = inlined_call_operand.vmem [shape: bf16[32,64], index: 4, kind: input, shape index: {}]   ;;  %s1613_s5 = inlined_call_operand.vmem [shape: bf16[64,64], index: 5, kind: input, shape index: {}]   ;;  %s1614_s6 = inlined_call_operand.vmem [shape: f32[1,64], index: 6, kind: input, shape index: {}]   ;;  %s1615_s7 = inlined_call_operand.hbm [shape: f32[2,32,64], index: 7, kind: output, shape index: {}]  }
   0x1   :  { %14 = vsyncpa [#allocation3 + $0x1], 0  ;;  %s1415_s24 = smov 0   ;;  %s1417_s25 = smov 0  }
   0x2   :  { %s1419_s26 = smov 0   ;;  %s1421_s27 = smov 0  }
   0x3 LB: > { %s1436_s28 = sadd.s32 4294967295, %s1366_s27   ;;  %s1065_s29 = sadd.s32 4294967294, %s1366_s27   ;;  %s1366_s27 = sphi %s1421_s27, %s1621_s27   ;;  %s1362_s26 = sphi %s1419_s26, %s1620_s26   ;;  %s1358_s25 = sphi %s1417_s25, %s1619_s25   ;;  %s1354_s24 = sphi %s1415_s24, %s1618_s24  }
   0x4   : > { %s1440_s30 = sadd.s32 1, %s1366_s27   ;;  %s184_s8 = sadd.s32 1, %s1362_s26 }
   0x5   : > { %s181_s9 = ssub.s32 %s1366_s27, %s1440_s30  ;;  %p194_p0 = scmp.ne.s32.totalorder %s1362_s26, %s1358_s25 }
   0x6   : > { %p182_p1 = scmp.eq.s32.totalorder %s181_s9, 0  ;;  %p195_p2 = scmp.eq.s32.totalorder %s1436_s28, 1 }
   0x7   : > { %p200_p3 = scmp.ne.s32.totalorder %s1358_s25, %s1354_s24  ;;  %p201_p4 = scmp.eq.s32.totalorder %s1065_s29, 1 }
   0x8   : > { %s1451_s10 = scalar_select %p182_p1, %s1362_s26, %s184_s8  }
   0x9   : > { %p1453_p5 = por %p195_p2, %p194_p0  ;;  %p1457_p6 = por %p201_p4, %p200_p3 }
   0xa   : > { %p1068_p7 = scmp.ge.s32.totalorder %s1366_s27, 1  ;;  %p250_p8 = scmp.lt.s32.totalorder %s1366_s27, 3 }
   0xc   : > { %p251_p9 = pnand %p1068_p7, %p250_p8 }
   0xd   : > { %v1260_v0 = vld [vmem:[%s1610_s2] sm:$0xff] (!%p251_p9)   ;;  %v1368_v1 = vmov (!%p251_p9), 0.0   ;;  %v1262_v3 = vld [vmem:[%s1610_s2 + $0x8] sm:$0xff] (!%p251_p9)   ;;  %vm1369_vm0 = vmmov (!%p251_p9), 0   ;;  %p287_p10 = scmp.lt.s32.totalorder (!%p251_p9), %s1436_s28, 1  ;;  %v1264_v5 = vld [vmem:[%s1610_s2 + $0x10] sm:$0xff] (!%p251_p9)  }
   0xe   : > { %254 = sbr.rel (%p251_p9) target bundleno = 1323 (0x52b), region = 48  ;;  %1151 = vmatprep.subr.bf16.mxu1 (!%p251_p9), %v1368_v1  ;;  %v1261_v2 = vld [vmem:[%s1611_s3] sm:$0xff] (!%p251_p9)   ;;  %1139 = vmatprep.subr.bf16.mxu0 (!%p251_p9), %v1260_v0  ;;  %v1263_v4 = vld [vmem:[%s1611_s3 + $0x8] sm:$0xff] (!%p251_p9)   ;;  %v1265_v6 = vld [vmem:[%s1610_s2 + $0x18] sm:$0xff] (!%p251_p9)   ;;  %vm411_vm1 = vcmask (!%p251_p9), 261120   ;;  %vm339_vm2 = vcmask (!%p251_p9), 523264  }
   0xf   : > { %1155 = vmatprep.mubr.msk.bf16.mxu1 (!%p251_p9), %vm1369_vm0, %v1368_v1  ;;  %1152 = vmatpush3.bf16.msra.mxu1 (!%p251_p9), %v1261_v2  ;;  %v1266_v13 = vld [vmem:[%s1612_s4] sm:$0xff] (!%p251_p9)   ;;  %v1267_v16 = vld [vmem:[%s1612_s4 + $0x8] sm:$0xff] (!%p251_p9)   ;;  %vm579_vm3 = vcmask (!%p251_p9), 130048   ;;  %s284_s20 = sand.u32 (!%p251_p9), 1, %s1358_s25   ;;  %s1108_s9 = sshll.u32 (!%p251_p9), %s1436_s28, 9 }
  0x10   : > { %1140 = vmatpush3.bf16.msra.mxu0 (!%p251_p9), %v1260_v0  ;;  %1153 = vmatprep.subr.bf16.mxu1 (!%p251_p9), %v1368_v1  ;;  %s1563_s15 = scalar_lea.hbm (!%p251_p9), %s1615_s7, %s1108_s9  ;;  %s1372_s17 = smov (!%p251_p9), [#allocation2]  }
  0x11   : > { %1141 = vmatprep.subr.bf16.mxu0 (!%p251_p9), %v1262_v3  ;;  %s1308_s18 = sshll.u32 (!%p251_p9), %s1372_s17, 4  ;;  %s1309_s18 = int_to_ptr.vmem [resolvable:$false] %s1308_s18 }
  0x13   : > { %1154 = vmatpush3.bf16.msra.mxu1 (!%p251_p9), %v1263_v4 }
  0x14   : > { %1142 = vmatpush3.bf16.msra.mxu0 (!%p251_p9), %v1262_v3  ;;  %1159 = vmatprep.subr.bf16.mxu1 (!%p251_p9), %v1368_v1 }
  0x15   : > { %s288_s21 = scalar_select %p287_p10, %s1436_s28, 1  ;;  %1143 = vmatprep.subr.bf16.mxu0 %v1264_v5 }
  0x16   : > { %s1567_s28 = scalar_lea.sflag [#allocation3], %s284_s20 }
  0x17   : > { %s1107_s29 = sshll.u32 %s288_s21, 4  ;;  %s1106_s8 = sshll.u32 %s288_s21, 5 }
  0x18   : > { %s296_s14 = scalar_lea.vmem %s1609_s1, %s1107_s29  ;;  %s291_s19 = scalar_lea.vmem %s1608_s0, %s1106_s8  ;;  %1144 = vmatpush3.bf16.msra.mxu0 %v1264_v5 }
  0x19   : > { %v304_v7 = vld [vmem:[%s296_s14] sm:$0xff]  ;;  %v305_v8 = vld [vmem:[%s296_s14 + $0x8] sm:$0xff]  ;;  %v300_v12 = vld [vmem:[%s291_s19 + $0x10] sm:$0xff]  ;;  %1145 = vmatprep.subr.bf16.mxu0 %v1265_v6  ;;  %s1370_s29 = smov 96   ;;  %s1069_s21 = sshll.u32 %s284_s20, 5 }
  0x1a   : > { %v298_v9 = vld [vmem:[%s291_s19] sm:$0xff]  ;;  %v306_v10 = vpack.c.bf16 %v305_v8, %v304_v7  ;;  %v299_v11 = vld [vmem:[%s291_s19 + $0x8] sm:$0xff]  ;;  %v301_v15 = vld [vmem:[%s291_s19 + $0x18] sm:$0xff]  ;;  %s1371_s19 = smov 32  }
  0x1b   : > { %v302_v14 = vpack.c.bf16 %v299_v11, %v298_v9  ;;  %v303_v17 = vpack.c.bf16 %v301_v15, %v300_v12 }
  0x1c   : > { %1156 = vmatmul.mubr.msk.bf16.vlgmr.msra.gmra.mrb[0].mxu1 %vm411_vm1, %v306_v10  ;;  %1146 = vmatpush3.bf16.msra.mxu0 %v1265_v6 }
  0x1d   : > { %1147 = vmatprep.mubr.msk.bf16.mxu0 %vm339_vm2, %v302_v14  ;;  %1160 = vmatpush3.bf16.msra.mxu1 %v1266_v13 }
  0x1e   : > { %1163 = vmatprep.mubr.msk.bf16.mxu1 %vm1369_vm0, %v1368_v1  ;;  %1161 = vmatprep.subr.bf16.mxu1 %v1368_v1 }
  0x1f   : > { %1148 = vmatmul.mubr.msk.bf16.vlgmr.msra.gmra.mrb[0].mxu0 %vm339_vm2, %v303_v17 }
  0x21   : > { %1162 = vmatpush3.bf16.msra.mxu1 %v1267_v16 }
  0x24   : > { %1164 = vmatmul.mubr.msk.bf16.vlgmr.msra.gmra.mrb[4].mxu1 %vm411_vm1, %v306_v10 }
  0xef   : > { %v449_v18 = vpop.f32.mrb[0].mxu1 }
  0xf0   : > { %v1157_v19 = vpop.f32.mrb[1].mxu1 }
  0xf1   : > { %v452_v20 = vpop.f32.mrb[2].mxu1 }
  0xf2   : > { %v515_v21 = vpack.c.bf16 %v452_v20, %v449_v18  ;;  %v1158_v22 = vpop.f32.mrb[3].mxu1  ;;  %v1149_v24 = vpop.f32.mrb[0].mxu0 }
  0xf3   : > { %v380_v25 = vpop.f32.mrb[1].mxu0 }
  0xf4   : > { %688 = vrot.lane.b32.xlu0 %v515_v21, %s1370_s29  ;;  %1203 = vmatprep.subr.msk.bf16.mxu1 %vm411_vm1, %v515_v21  ;;  %v524_v23 = vsel %vm411_vm1, %v515_v21, 0  ;;  %v1150_v26 = vpop.f32.mrb[2].mxu0 }
  0xf5   : > { %1168 = vmatpush3.bf16.xpose.msra.mxu1 %v524_v23  ;;  %v514_v28 = vpack.c.bf16 %v1150_v26, %v1149_v24  ;;  %v383_v29 = vpop.f32.mrb[3].mxu0 }
  0xf6   : > { %v513_v31 = vpack.c.bf16 %v383_v29, %v380_v25 }
  0xf7   : > { %v506_v27 = vpop.f32.mrb[4].mxu1  ;;  %685 = vrot.lane.b32.xlu1 %v514_v28, %s1370_s29 }
  0xf8   : > { %v1165_v30 = vpop.f32.mrb[5].mxu1  ;;  %683 = vrot.lane.b32.xlu0 %v513_v31, %s1370_s29  ;;  %1169 = vmatprep.mubr.msk.bf16.mxu1 %vm411_vm1, %v513_v31 }
  0xf9   : > { %v509_v32 = vpop.f32.mrb[6].mxu1 }
  0xfa   : > { %v516_v33 = vpack.c.bf16 %v509_v32, %v506_v27  ;;  %v1166_v34 = vpop.f32.mrb[7].mxu1 }
  0xfc   : > { %1170 = vmatmul.mubr.msk.bf16.vlgmr.msra.gmra.mrb[8].mxu1 %vm411_vm1, %v514_v28  ;;  %1173 = vmatprep.subr.bf16.mxu1 %v516_v33 }
  0xfd   : > { %1174 = vmatpush3.bf16.msra.mxu1 %v516_v33 }
 0x166   : > { %v689_v35 = vpop.permute.xlu0 %688 }
 0x167   : > { %v697_v36 = vsel %vm411_vm1, %v689_v35, 0  ;;  %1204 = vmatprep.subr.msk.bf16.mxu0 %vm411_vm1, %v689_v35 }
 0x168   : > { %1180 = vmatpush3.bf16.xpose.msra.mxu0 %v697_v36 }
 0x169   : > { %v686_v38 = vpop.permute.xlu1 %685 }
 0x16a   : > { %v684_v37 = vpop.permute.xlu0 %683 }
 0x16b   : > { %1181 = vmatprep.mubr.msk.bf16.mxu0 %vm411_vm1, %v684_v37 }
 0x16f   : > { %1182 = vmatmul.mubr.msk.bf16.vlgmr.msra.gmra.mrb[4].mxu0 %vm411_vm1, %v686_v38 }
 0x1cf   : > { %v1171_v39 = vpop.f32.mrb[8].mxu1 }
 0x1d0   : > { %v577_v40 = vmul.f32 0.17677669, %v1171_v39  ;;  %v560_v41 = vpop.f32.mrb[9].mxu1 }
 0x1d1   : > { %v575_v42 = vmul.f32 0.17677669, %v560_v41  ;;  %v1172_v43 = vpop.f32.mrb[10].mxu1 }
 0x1d2   : > { %v563_v44 = vpop.f32.mrb[11].mxu1  ;;  %v586_v45 = vsel %vm579_vm3, %v577_v40, -inf  ;;  %v578_v46 = vmul.f32 0.17677669, %v1172_v43 }
 0x1d3   : > { %v576_v47 = vmul.f32 0.17677669, %v563_v44  ;;  %587 = vmax.xlane.f32.xlu0 %v586_v45  ;;  %v580_v48 = vsel %vm579_vm3, %v575_v42, -inf }
 0x1d4   : > { %581 = vmax.xlane.f32.xlu1 %v580_v48  ;;  %v589_v50 = vsel %vm579_vm3, %v578_v46, -inf }
 0x1d5   : > { %v583_v49 = vsel %vm579_vm3, %v576_v47, -inf }
 0x1d7   : > { %584 = vmax.xlane.f32.xlu0 %v583_v49 }
 0x1d8   : > { %590 = vmax.xlane.f32.xlu1 %v589_v50 }
 0x242   : > { %v1183_v51 = vpop.f32.mrb[4].mxu0 }
 0x243   : > { %v750_v52 = vmul.f32 0.17677669, %v1183_v51  ;;  %v733_v53 = vpop.f32.mrb[5].mxu0 }
 0x244   : > { %v1184_v54 = vpop.f32.mrb[6].mxu0  ;;  %v748_v55 = vmul.f32 0.17677669, %v733_v53 }
 0x245   : > { %v736_v56 = vpop.f32.mrb[7].mxu0  ;;  %v758_v57 = vsel %vm579_vm3, %v750_v52, -inf  ;;  %v751_v59 = vmul.f32 0.17677669, %v1184_v54  ;;  %v1270_v54 = vld [vmem:[%s1613_s5 + $0x10] sm:$0xff]  }
 0x246   : > { %v749_v58 = vmul.f32 0.17677669, %v736_v56  ;;  %759 = vmax.xlane.f32.xlu0 %v758_v57  ;;  %v752_v61 = vsel %vm579_vm3, %v748_v55, -inf  ;;  %v1271_v57 = vld [vmem:[%s1613_s5 + $0x18] sm:$0xff]  }
 0x247   : > { %v761_v62 = vsel %vm579_vm3, %v751_v59, -inf }
 0x248   : > { %v755_v60 = vsel %vm579_vm3, %v749_v58, -inf }
 0x249   : > { %756 = vmax.xlane.f32.xlu1 %v755_v60 }
 0x24a   : > { %753 = vmax.xlane.f32.xlu0 %v752_v61 }
 0x24d   : > { %762 = vmax.xlane.f32.xlu1 %v761_v62 }
 0x260   : > { %v588_v63 = vpop.xlane.xlu0 %587  ;;  %791 = vrot.lane.b32.xlu0 %v516_v33, %s1370_s29  ;;  %s286_s29 = scalar_lea.vmem [#allocation2], %s1069_s21 }
 0x261   : > { %v594_v0 = vsub.f32 %v577_v40, %v588_v63  ;;  %v582_v1 = vpop.xlane.xlu1 %581  ;;  %s991_s8 = sshll.u32 %s286_s29, 4  ;;  %s1557_s8 = int_to_ptr.vmem [resolvable:$true] %s991_s8 }
 0x262   : > { %v592_v2 = vsub.f32 %v575_v42, %v582_v1  ;;  %s1304_s16 = scalar_lea.vmem %s1557_s8, 512  ;;  %p1311_p0 = scmp.lt.s32.totalorder %s1557_s8, %s1309_s18 }
 0x263   : > { %v600_v3 = vmul.f32 1.442695, %v594_v0  ;;  %p1305_p11 = scmp.ne.s32.totalorder %s1557_s8, %s1304_s16 }
 0x264   : > { %v596_v4 = vmul.f32 1.442695, %v592_v2  ;;  %v585_v5 = vpop.xlane.xlu0 %584 }
 0x265   : > { %v593_v6 = vsub.f32 %v576_v47, %v585_v5  ;;  %v591_v7 = vpop.xlane.xlu1 %590  ;;  %1272 = vpow2.f32 %v600_v3  ;;  %v1269_v47 = vld [vmem:[%s1613_s5 + $0x8] sm:$0xff]   ;;  %p1306_p12 = pnand %p1305_p11, %p1453_p5 }
 0x266   : > { %v595_v8 = vsub.f32 %v578_v46, %v591_v7  ;;  %1274 = vpow2.f32 %v596_v4  ;;  %v1268_v46 = vld [vmem:[%s1613_s5] sm:$0xff]  }
 0x267   : > { %v598_v9 = vmul.f32 1.442695, %v593_v6  ;;  %1191 = vmatprep.subr.bf16.mxu0 %v1268_v46  ;;  %p1307_p13 = pneg %p1306_p12 }
 0x268   : > { %v602_v10 = vmul.f32 1.442695, %v595_v8  ;;  %1192 = vmatpush3.bf16.msra.mxu0 %v1268_v46 }
 0x269   : > { %1276 = vpow2.f32 %v598_v9  ;;  %1193 = vmatprep.subr.bf16.mxu0 %v1269_v47 }
 0x26a   : > { %1278 = vpow2.f32 %v602_v10 }
 0x26c   : > { %1194 = vmatpush3.bf16.msra.mxu0 %v1269_v47 }
 0x26d   : > { %1195 = vmatprep.subr.bf16.mxu0 %v1270_v54 }
 0x26f   : > { %v1273_v11 = vpop.eup %1272 }
 0x270   : > { %v1275_v12 = vpop.eup %1274  ;;  %v610_v17 = vsel %vm579_vm3, %v1273_v11, 0.0  ;;  %1196 = vmatpush3.bf16.msra.mxu0 %v1270_v54 }
 0x271   : > { %v604_v41 = vsel %vm579_vm3, %v1275_v12, 0.0  ;;  %1197 = vmatprep.subr.bf16.mxu0 %v1271_v57 }
 0x273   : > { %v1277_v13 = vpop.eup %1276 }
 0x274   : > { %v1279_v14 = vpop.eup %1278  ;;  %v616_v15 = vpack.c.bf16 %v1277_v13, %v1275_v12  ;;  %v607_v42 = vsel %vm579_vm3, %v1277_v13, 0.0  ;;  %1198 = vmatpush3.bf16.msra.mxu0 %v1271_v57 }
 0x275   : > { %v617_v16 = vpack.c.bf16 %v1279_v14, %v1273_v11  ;;  %v613_v43 = vsel %vm579_vm3, %v1279_v14, 0.0 }
 0x276   : > { %1175 = vmatprep.mubr.msk.bf16.mxu1 %vm579_vm3, %v616_v15 }
 0x277   : > { %1176 = vmatmul.mubr.msk.bf16.vlgmr.msra.gmra.mrb[12].mxu1 %vm579_vm3, %v617_v16 }
 0x27f   : > { %611 = vadd.xlane.f32.xlu0 %v610_v17 }
 0x2d3   : > { %v760_v18 = vpop.xlane.xlu0 %759 }
 0x2d4   : > { %v766_v19 = vsub.f32 %v750_v52, %v760_v18 }
 0x2d6   : > { %v772_v20 = vmul.f32 1.442695, %v766_v19  ;;  %v757_v21 = vpop.xlane.xlu1 %756 }
 0x2d7   : > { %v765_v22 = vsub.f32 %v749_v58, %v757_v21  ;;  %v754_v23 = vpop.xlane.xlu0 %753 }
 0x2d8   : > { %1280 = vpow2.f32 %v772_v20  ;;  %v764_v24 = vsub.f32 %v748_v55, %v754_v23 }
 0x2d9   : > { %v770_v25 = vmul.f32 1.442695, %v765_v22 }
 0x2da   : > { %v768_v26 = vmul.f32 1.442695, %v764_v24  ;;  %v763_v27 = vpop.xlane.xlu1 %762 }
 0x2db   : > { %1282 = vpow2.f32 %v770_v25  ;;  %v767_v28 = vsub.f32 %v751_v59, %v763_v27  ;;  %v792_v29 = vpop.permute.xlu0 %791 }
 0x2dc   : > { %1284 = vpow2.f32 %v768_v26  ;;  %1185 = vmatprep.subr.bf16.mxu1 %v792_v29 }
 0x2dd   : > { %v774_v30 = vmul.f32 1.442695, %v767_v28  ;;  %1186 = vmatpush3.bf16.msra.mxu1 %v792_v29 }
 0x2df   : > { %1286 = vpow2.f32 %v774_v30  ;;  %v1094_v30 = vld [vmem:[%s1614_s6] ss:$0 sm:$0xff] }
 0x2e2   : > { %v1281_v31 = vpop.eup %1280 }
 0x2e3   : > { %v782_v32 = vsel %vm579_vm3, %v1281_v31, 0.0 }
 0x2e4   : > { %783 = vadd.xlane.f32.xlu1 %v782_v32 }
 0x2e5   : > { %v1283_v33 = vpop.eup %1282 }
 0x2e6   : > { %v1285_v34 = vpop.eup %1284  ;;  %v779_v39 = vsel %vm579_vm3, %v1283_v33, 0.0 }
 0x2e7   : > { %v776_v35 = vsel %vm579_vm3, %v1285_v34, 0.0  ;;  %v788_v36 = vpack.c.bf16 %v1283_v33, %v1285_v34 }
 0x2e8   : > { %777 = vadd.xlane.f32.xlu1 %v776_v35 }
 0x2e9   : > { %v1287_v37 = vpop.eup %1286  ;;  %1187 = vmatprep.mubr.msk.bf16.mxu1 %vm579_vm3, %v788_v36 }
 0x2ea   : > { %v789_v38 = vpack.c.bf16 %v1287_v37, %v1281_v31  ;;  %v785_v40 = vsel %vm579_vm3, %v1287_v37, 0.0 }
 0x2ec   : > { %780 = vadd.xlane.f32.xlu1 %v779_v39  ;;  %1188 = vmatmul.mubr.msk.bf16.vlgmr.msra.gmra.mrb[16].mxu1 %vm579_vm3, %v789_v38 }
 0x2f0   : > { %786 = vadd.xlane.f32.xlu1 %v785_v40 }
 0x2f4   : > { %605 = vadd.xlane.f32.xlu1 %v604_v41 }
 0x2f8   : > { %608 = vadd.xlane.f32.xlu1 %v607_v42 }
 0x2fc   : > { %614 = vadd.xlane.f32.xlu1 %v613_v43 }
 0x30c   : > { %v612_v9 = vpop.xlane.xlu0 %611 }
 0x34a   : > { %v1177_v44 = vpop.f32.mrb[12].mxu1 }
 0x34b   : > { %v658_v45 = vpop.f32.mrb[13].mxu1 }
 0x34c   : > { %v1178_v48 = vpop.f32.mrb[14].mxu1 }
 0x34d   : > { %v661_v49 = vpop.f32.mrb[15].mxu1 }
 0x371   : > { %v784_v50 = vpop.xlane.xlu1 %783 }
 0x372   : > { %1288 = vrcp.f32 %v784_v50 }
 0x375   : > { %v778_v51 = vpop.xlane.xlu1 %777 }
 0x376   : > { %1290 = vrcp.f32 %v778_v51 }
 0x379   : > { %v781_v52 = vpop.xlane.xlu1 %780 }
 0x37c   : > { %v1289_v55 = vpop.eup %1288 }
 0x37d   : > { %v787_v53 = vpop.xlane.xlu1 %786 }
 0x37e   : > { %1292 = vrcp.f32 %v787_v53 }
 0x37f   : > { %1294 = vrcp.f32 %v781_v52 }
 0x380   : > { %v1291_v58 = vpop.eup %1290 }
 0x381   : > { %v606_v6 = vpop.xlane.xlu1 %605 }
 0x382   : > { %1296 = vrcp.f32 %v606_v6 }
 0x385   : > { %v609_v7 = vpop.xlane.xlu1 %608 }
 0x386   : > { %1298 = vrcp.f32 %v609_v7 }
 0x388   : > { %v1293_v60 = vpop.eup %1292 }
 0x389   : > { %v1295_v62 = vpop.eup %1294  ;;  %v615_v8 = vpop.xlane.xlu1 %614 }
 0x38a   : > { %1300 = vrcp.f32 %v615_v8 }
 0x38b   : > { %1302 = vrcp.f32 %v612_v9 }
 0x38c   : > { %v1297_v10 = vpop.eup %1296 }
 0x38d   : > { %v677_v13 = vmul.f32 %v1297_v10, %v658_v45 }
 0x390   : > { %v1299_v11 = vpop.eup %1298 }
 0x391   : > { %v678_v14 = vmul.f32 %v1299_v11, %v661_v49 }
 0x394   : > { %v1301_v17 = vpop.eup %1300 }
 0x395   : > { %v1303_v20 = vpop.eup %1302  ;;  %v680_v24 = vmul.f32 %v1301_v17, %v1178_v48 }
 0x396   : > { %v679_v23 = vmul.f32 %v1303_v20, %v1177_v44 }
 0x3bf   : > { %v1189_v56 = vpop.f32.mrb[16].mxu1 }
 0x3c0   : > { %v834_v59 = vpop.f32.mrb[17].mxu1  ;;  %v855_v63 = vmul.f32 %v1289_v55, %v1189_v56 }
 0x3c1   : > { %v1190_v61 = vpop.f32.mrb[18].mxu1  ;;  %v853_v2 = vmul.f32 %v1291_v58, %v834_v59 }
 0x3c2   : > { %v856_v0 = vmul.f32 %v1293_v60, %v1190_v61  ;;  %v837_v1 = vpop.f32.mrb[19].mxu1 }
 0x3c3   : > { %v854_v3 = vmul.f32 %v1295_v62, %v837_v1 }
 0x3c4   : > { %v1255_v4 = vpack.i.bf16 %v856_v0, %v855_v63 }
 0x3c5   : > { %v1250_v5 = vpack.i.bf16 %v854_v3, %v853_v2 }
 0x3c7   : > { %1251 = vrot.lane.b32.xlu1 %v1250_v5, %s1371_s19 }
 0x3cb   : > { %1256 = vrot.lane.b32.xlu1 %v1255_v4, %s1371_s19  ;;  %s1310_s19 = scalar_lea.vmem %s1309_s18, 1024 }
 0x3cc   : > { %p1312_p1 = scmp.lt.s32.totalorder %s1310_s19, %s1304_s16 }
 0x3ce   : > { %p1313_p2 = por %p1312_p1, %p1311_p0 }
 0x3d0   : > { %p1314_p3 = pnand %p1313_p2, %p1307_p13 }
 0x439   : > { %v1252_v12 = vpop.permute.xlu1 %1251 }
 0x43a   : > { %v1254_v15 = vunpack.i.h.bf16 %v1252_v12  ;;  %v1253_v16 = vunpack.i.l.bf16 %v1252_v12 }
 0x43c   : > { %v874_v18 = vsel %vm411_vm1, %v678_v14, %v1254_v15  ;;  %v873_v19 = vsel %vm411_vm1, %v677_v13, %v1253_v16 }
 0x43d   : > { %v877_v21 = vpack.c.bf16 %v874_v18, %v873_v19  ;;  %v1257_v22 = vpop.permute.xlu1 %1256 }
 0x43e   : > { %v1259_v25 = vunpack.i.h.bf16 %v1257_v22  ;;  %v1258_v26 = vunpack.i.l.bf16 %v1257_v22 }
 0x43f   : > { %1199 = vmatprep.mubr.msk.bf16.mxu0 %vm339_vm2, %v877_v21 }
 0x440   : > { %v876_v27 = vsel %vm411_vm1, %v680_v24, %v1259_v25  ;;  %v875_v28 = vsel %vm411_vm1, %v679_v23, %v1258_v26 }
 0x441   : > { %v878_v29 = vpack.c.bf16 %v876_v27, %v875_v28 }
 0x443   : > { %1200 = vmatmul.mubr.msk.bf16.vlgmr.msra.gmra.mrb[8].mxu0 %vm339_vm2, %v878_v29 }
 0x516   : > { %v1201_v31 = vpop.f32.mrb[8].mxu0 }
 0x517   : > { %v967_v32 = vadd.f32 %v1201_v31, %v1094_v30  ;;  %v958_v33 = vpop.f32.mrb[9].mxu0 }
 0x518   : > { %v959_v34 = vadd.f32 %v1094_v30, %v958_v33  ;;  %v1202_v35 = vpop.f32.mrb[10].mxu0 }
 0x519   : > { %975 = vst.msk [vmem:[%s286_s29 + $0x10] sm:$0xff] %vm339_vm2, %v967_v32  ;;  %v970_v36 = vadd.f32 %v1202_v35, %v1094_v30  ;;  %v961_v37 = vpop.f32.mrb[11].mxu0 }
 0x51a   : > { %973 = vst.msk [vmem:[%s286_s29] sm:$0xff] %vm339_vm2, %v959_v34  ;;  %v962_v38 = vadd.f32 %v1094_v30, %v961_v37 }
 0x51b   : > { %976 = vst.msk [vmem:[%s286_s29 + $0x18] sm:$0xff] %vm339_vm2, %v970_v36 }
 0x51c   : > { %974 = vst.msk [vmem:[%s286_s29 + $0x8] sm:$0xff] %vm339_vm2, %v962_v38 }
 0x51d   : > { %1317 = shalt.err (!%p1314_p3)
}
 0x51e   : > { %s1318_s20 = scalar_lea.hbm %s1563_s15, 512  ;;  %s1322_s23 = scalar_lea.hbm %s1615_s7, 1024 }
 0x51f   : > { %p1319_p4 = scmp.ne.s32.totalorder %s1563_s15, %s1318_s20  ;;  %p1323_p9 = scmp.lt.u32.totalorder %s1563_s15, %s1615_s7 }
 0x520   : > { %p1324_p10 = scmp.lt.u32.totalorder %s1322_s23, %s1318_s20  ;;  %p1326_p12 = scmp.lt.u32.totalorder %s1318_s20, %s1563_s15 }
 0x521   : > { %p1320_p7 = pnand %p1319_p4, %p1453_p5 }
 0x522   : > { %p1325_p11 = por %p1324_p10, %p1323_p9 }
 0x523   : > { %p1321_p8 = pneg %p1320_p7 }
 0x524   : > { %p1327_p13 = por %p1326_p12, %p1325_p11 }
 0x526   : > { %p1328_p0 = pnand %p1327_p13, %p1321_p8 }
 0x528   : > { %1331 = shalt.err (!%p1328_p0)
}
 0x529   : > { %s1373_s13 = smov 128   ;;  %s1374_s14 = smov 8  }
 0x52a   : > { %1205 = dma.vmem_to_hbm [thread:$0]  (%p1453_p5), %s1557_s8, 512, %s1563_s15, %s1567_s28, %s1373_s13, %s1373_s13, %s1374_s14  }
 0x52b PF: > { %p1211_p1 = scmp.ge.s32.totalorder %s1366_s27, 2  ;;  %s1006_s16 = sand.u32 1, %s1354_s24  }
 0x52c   : > { %s1007_s17 = scalar_lea.sflag [#allocation3], %s1006_s16 }
 0x52d   : > { %p1208_p2 = pnand %p1211_p1, %p1457_p6 }
 0x52f   : > { %1349 = dma.done.wait (!%p1208_p2), %s1007_s17, 512  }
 0x530   : > { %1351 = vsyncadd (!%p1208_p2), %s1007_s17, 4294966784  ;;  %p17_p3 = scmp.ge.s32.totalorder %s1440_s30, 4   ;;  %s1618_s24 = smov %s1358_s25 }
 0x531   : > { %s1619_s25 = smov %s1362_s26  ;;  %s1620_s26 = smov %s1451_s10 }
 0x532   : > { %s1621_s27 = smov %s1440_s30  ;;  %19 = sbr.rel (!%p17_p3) target bundleno = 3 (0x3), region = 86 }
 0x539   :  { %1012 = vsyncpa [#allocation3], 1 }
 0x53a   :  { %1014 = vsyncpa [#allocation3 + $0x1], 1 }

</bundles_post_ra>
